<compile_context>
chip_gen: v5e
topology: v5e:2x2
jax: 0.10.0
libtpu: 0.0.40
codegen_flags: <defaults>
</compile_context>

<pallas_src>
import jax
import jax.numpy as jnp
from jax.experimental import pallas as pl
from jax.experimental.pallas import tpu as pltpu

LANES = 128
MAX_BLOCK_ROWS = 4096   # 4096 x 128 f32 = 2 MiB per input block


def _bce_pn1_kernel(x_ref, y_ref, o_ref):
    """One (block_rows, 128) tile: elementwise loss folded into an (8,128) accumulator."""
    b = pl.program_id(1)          # reduction axis (last, "arbitrary")

    @pl.when(b == 0)
    def _():
        o_ref[...] = jnp.zeros_like(o_ref)

    x = (x_ref[...].astype(jnp.float32) + 1.0) * 0.5
    y = (y_ref[...].astype(jnp.float32) + 1.0) * 0.5
    # Numerically stable BCE-with-logits (matches PyTorch):
    #   max(x, 0) - x*y + log(1 + exp(-|x|))
    loss = jnp.maximum(x, 0.0) - x * y + jnp.log1p(jnp.exp(-jnp.abs(x)))

    # Fold (block_rows, 128) -> (8, 128) with leading-axis adds (VPU only; the
    # expensive cross-lane reduce happens once in the wrapper).
    block_rows = loss.shape[0]
    o_ref[...] += jnp.sum(loss.reshape(block_rows // 8, 8, LANES), axis=0)


def _bce_elementwise(x, y):
    x = (x.astype(jnp.float32) + 1.0) * 0.5
    y = (y.astype(jnp.float32) + 1.0) * 0.5
    return jnp.maximum(x, 0.0) - x * y + jnp.log1p(jnp.exp(-jnp.abs(x)))


def bce_with_logits_loss_pn_one(inp, tgt):
    """Pallas implementation of BCEWithLogitsLossPNOne.forward(input, target)."""
    assert inp.shape == tgt.shape
    n = inp.size
    fx = inp.reshape(-1)
    fy = tgt.reshape(-1)

    r_full = n // LANES                                  # complete 128-lane rows
    block_rows = min(MAX_BLOCK_ROWS, (r_full // 8) * 8)  # multiple of 8 sublanes

    if block_rows == 0:
        # Degenerate tiny input (< 1024 elements): nothing to tile.
        return jnp.sum(_bce_elementwise(fx, fy)) / jnp.float32(n)

    n_blocks = r_full // block_rows
    main_rows = n_blocks * block_rows
    main_n = main_rows * LANES

    # Split the stream across both TensorCores (v7x megacore); serial & harmless
    # on single-core chips.
    num_parts = 2 if (n_blocks >= 2 and n_blocks % 2 == 0) else 1
    blocks_per_part = n_blocks // num_parts

    fx_main = fx if main_n == n else fx[:main_n]
    fy_main = fy if main_n == n else fy[:main_n]
    x2d = fx_main.reshape(main_rows, LANES)
    y2d = fy_main.reshape(main_rows, LANES)

    in_map = lambda p, b: (p * blocks_per_part + b, 0)

    partial = pl.pallas_call(
        _bce_pn1_kernel,
        out_shape=jax.ShapeDtypeStruct((num_parts * 8, LANES), jnp.float32),
        grid_spec=pltpu.PrefetchScalarGridSpec(
            num_scalar_prefetch=0,
            grid=(num_parts, blocks_per_part),
            in_specs=[
                pl.BlockSpec((block_rows, LANES), in_map),
                pl.BlockSpec((block_rows, LANES), in_map),
            ],
            out_specs=pl.BlockSpec((8, LANES), lambda p, b: (p, 0)),
        ),
        compiler_params=pltpu.CompilerParams(
            dimension_semantics=("parallel", "arbitrary"),
            # 2 inputs x 2 buffers x 2 MiB = 8 MiB worst case; 32 MiB is <=
            # physical VMEM on every generation (v7x included).
            vmem_limit_bytes=32 << 20,
        ),
        cost_estimate=pl.CostEstimate(
            flops=8 * main_n,
            transcendentals=2 * main_n,
            bytes_accessed=2 * main_n * inp.dtype.itemsize
            + num_parts * 8 * LANES * 4,
        ),
    )(x2d, y2d)

    total = jnp.sum(partial)                             # one small reduce in XLA

    if main_n < n:                                       # ragged tail (< one block)
        total = total + jnp.sum(_bce_elementwise(fx[main_n:], fy[main_n:]))

    return total / jnp.float32(n)


def _reference(inp, tgt):
    """Pure-JAX reference for a sanity check."""
    return jnp.mean(_bce_elementwise(inp, tgt))


if __name__ == "__main__":
    key = jax.random.PRNGKey(0)
    k1, k2 = jax.random.split(key)

    # Small shapes consistent with the module (elementwise over any shape).
    shape = (2, 4, 16, 16)
    inp = jax.random.normal(k1, shape, dtype=jnp.float32)
    # targets in {-1, +1} as the "PNOne" name implies
    tgt = jnp.where(jax.random.bernoulli(k2, 0.5, shape), 1.0, -1.0).astype(jnp.float32)

    loss = bce_with_logits_loss_pn_one(inp, tgt)
    jax.block_until_ready(loss)

    ref = _reference(inp, tgt)
    assert jnp.allclose(loss, ref, atol=1e-5, rtol=1e-5), (loss, ref)

    print("KERNEL_OK")
</pallas_src>

<mosaic_0001>
module attributes {stable_mosaic.version = 11 : i64} {
  func.func @_bce_pn1_kernel(%arg0: i32, %arg1: i32, %arg2: memref<16x128xf32, #tpu.memory_space<vmem>>, %arg3: memref<16x128xf32, #tpu.memory_space<vmem>>, %arg4: memref<8x128xf32, #tpu.memory_space<vmem>>) attributes {dimension_semantics = [#tpu.dimension_semantics<parallel>, #tpu.dimension_semantics<arbitrary>], iteration_bounds = array<i64: 1, 1>, scalar_prefetch = 0 : i64, scratch_operands = 0 : i64, tpu.core_type = #tpu.core_type<tc>, window_params = [{transform_indices = @transform_0, window_bounds = array<i64: 16, 128>}, {transform_indices = @transform_1, window_bounds = array<i64: 16, 128>}, {transform_indices = @transform_2, window_bounds = array<i64: 8, 128>}]} {
    %c0_i32 = arith.constant 0 : i32
    %0 = arith.cmpi eq, %arg1, %c0_i32 : i32
    %1 = arith.extui %0 : i1 to i32
    %c0_i32_0 = arith.constant 0 : i32
    %2 = arith.cmpi ne, %1, %c0_i32_0 : i32
    scf.if %2 {
      %cst_14 = arith.constant 0.000000e+00 : f32
      %28 = vector.broadcast %cst_14 : f32 to vector<8x128xf32>
      %c0_15 = arith.constant 0 : index
      %c0_16 = arith.constant 0 : index
      %29 = vector.load %arg4[%c0_15, %c0_16] : memref<8x128xf32, #tpu.memory_space<vmem>>, vector<8x128xf32>
      tpu.vector_store %arg4[%c0_15, %c0_16], %28 {strides = array<i32>} : memref<8x128xf32, #tpu.memory_space<vmem>>, vector<8x128xf32>,
    } else {
    }
    %c0 = arith.constant 0 : index
    %c0_1 = arith.constant 0 : index
    %3 = vector.load %arg2[%c0, %c0_1] : memref<16x128xf32, #tpu.memory_space<vmem>>, vector<16x128xf32>
    %cst = arith.constant 1.000000e+00 : f32
    %4 = vector.broadcast %cst : f32 to vector<16x128xf32>
    %5 = arith.addf %3, %4 : vector<16x128xf32>
    %cst_2 = arith.constant 5.000000e-01 : f32
    %6 = vector.broadcast %cst_2 : f32 to vector<16x128xf32>
    %7 = arith.mulf %5, %6 : vector<16x128xf32>
    %c0_3 = arith.constant 0 : index
    %c0_4 = arith.constant 0 : index
    %8 = vector.load %arg3[%c0_3, %c0_4] : memref<16x128xf32, #tpu.memory_space<vmem>>, vector<16x128xf32>
    %cst_5 = arith.constant 1.000000e+00 : f32
    %9 = vector.broadcast %cst_5 : f32 to vector<16x128xf32>
    %10 = arith.addf %8, %9 : vector<16x128xf32>
    %cst_6 = arith.constant 5.000000e-01 : f32
    %11 = vector.broadcast %cst_6 : f32 to vector<16x128xf32>
    %12 = arith.mulf %10, %11 : vector<16x128xf32>
    %cst_7 = arith.constant 0.000000e+00 : f32
    %13 = vector.broadcast %cst_7 : f32 to vector<16x128xf32>
    %14 = arith.maximumf %7, %13 : vector<16x128xf32>
    %15 = arith.mulf %7, %12 : vector<16x128xf32>
    %16 = arith.subf %14, %15 : vector<16x128xf32>
    %17 = math.absf %7 : vector<16x128xf32>
    %cst_8 = arith.constant 0.000000e+00 : f32
    %18 = vector.broadcast %cst_8 : f32 to vector<16x128xf32>
    %19 = arith.subf %18, %17 : vector<16x128xf32>
    %20 = math.exp %19 : vector<16x128xf32>
    %21 = math.log1p %20 : vector<16x128xf32>
    %22 = arith.addf %16, %21 : vector<16x128xf32>
    %c0_9 = arith.constant 0 : index
    %c0_10 = arith.constant 0 : index
    %23 = vector.load %arg4[%c0_9, %c0_10] : memref<8x128xf32, #tpu.memory_space<vmem>>, vector<8x128xf32>
    %24 = vector.shape_cast %22 : vector<16x128xf32> to vector<2x8x128xf32>
    %cst_11 = arith.constant dense<0.000000e+00> : vector<8x128xf32>
    %25 = vector.multi_reduction <add>, %24, %cst_11 [0] : vector<2x8x128xf32> to vector<8x128xf32>
    %26 = arith.addf %23, %25 : vector<8x128xf32>
    %c0_12 = arith.constant 0 : index
    %c0_13 = arith.constant 0 : index
    %27 = vector.load %arg4[%c0_12, %c0_13] : memref<8x128xf32, #tpu.memory_space<vmem>>, vector<8x128xf32>
    tpu.vector_store %arg4[%c0_12, %c0_13], %26 {strides = array<i32>} : memref<8x128xf32, #tpu.memory_space<vmem>>, vector<8x128xf32>,
    return
  }
  func.func @transform_0(%arg0: i32, %arg1: i32) -> (i32, i32) {
    %c1_i32 = arith.constant 1 : i32
    %0 = arith.muli %arg0, %c1_i32 : i32
    %1 = arith.addi %0, %arg1 : i32
    %c0_i32 = arith.constant 0 : i32
    %c0_i32_0 = arith.constant 0 : i32
    return %1, %c0_i32 : i32, i32
  }
  func.func @transform_1(%arg0: i32, %arg1: i32) -> (i32, i32) {
    %c1_i32 = arith.constant 1 : i32
    %0 = arith.muli %arg0, %c1_i32 : i32
    %1 = arith.addi %0, %arg1 : i32
    %c0_i32 = arith.constant 0 : i32
    %c0_i32_0 = arith.constant 0 : i32
    return %1, %c0_i32 : i32, i32
  }
  func.func @transform_2(%arg0: i32, %arg1: i32) -> (i32, i32) {
    %c0_i32 = arith.constant 0 : i32
    %c0_i32_0 = arith.constant 0 : i32
    return %arg0, %c0_i32 : i32, i32
  }
}

</mosaic_0001>

<bundles_post_ra>
// kernel: tpu_custom_call.1
= control target key start
LH: loop header
LB: loop body
LE: loop exit
PB: predicated region body
PF: predicated region fallthrough
CT: control target
= control target key end

     0   :  { %7 = vsyncpa [#allocation3], 0  ;;  %s250_s0 = inlined_call_operand.hbm [shape: f32[16,128], index: 0, kind: input, shape index: {}]   ;;  %s251_s1 = inlined_call_operand.hbm [shape: f32[16,128], index: 1, kind: input, shape index: {}]   ;;  %s252_s2 = inlined_call_operand.hbm [shape: f32[8,128], index: 2, kind: output, shape index: {}]  }
   0x1   :  { %8 = vsyncpa [#allocation6], 0 }
   0x2   :  { %9 = vsyncpa [#allocation4], 0  ;;  %s18_s11 = sshll.u32 %s250_s0, 4  ;;  %s221_s12 = smov [#allocation2]   ;;  %s19_s11 = int_to_ptr.hbm [resolvable:$true] %s18_s11 }
   0x3   :  { %s20_s13 = sshll.u32 %s221_s12, 4  ;;  %s35_s16 = sshll.u32 %s251_s1, 4  ;;  %s21_s13 = int_to_ptr.vmem [resolvable:$true] %s20_s13  ;;  %s36_s16 = int_to_ptr.hbm [resolvable:$true] %s35_s16 }
   0x4   :  { %s222_s17 = smov 128   ;;  %s223_s18 = smov 8  }
   0x5   :  { %26 = dma.hbm_to_vmem [thread:$0]  %s19_s11, 256, %s21_s13, [#allocation3], %s222_s17, %s222_s17, %s223_s18  }
   0x6   :  { %s224_s19 = smov [#allocation5]  }
   0x7   :  { %s37_s20 = sshll.u32 %s224_s19, 4  ;;  %s38_s20 = int_to_ptr.vmem [resolvable:$true] %s37_s20 }
   0x8   :  { %43 = dma.hbm_to_vmem [thread:$0]  %s36_s16, 256, %s38_s20, [#allocation6], %s222_s17, %s222_s17, %s223_s18  }
   0x9   :  { %215 = dma.done.wait [#allocation3], 256  }
   0xa   :  { %216 = vsyncadd [#allocation3], 4294967040 }
   0xb   :  { %217 = dma.done.wait [#allocation6], 256  }
   0xc   :  { %218 = vsyncadd [#allocation6], 4294967040  ;;  %v61_v0 = vld [vmem:[#allocation2] sm:$0xff]  ;;  %v62_v1 = vld [vmem:[#allocation2 + $0x8] sm:$0xff]  ;;  %s225_s0 = smov [#allocation7]   ;;  %s118_s23 = sshll.u32 %s252_s2, 4  ;;  %s119_s23 = int_to_ptr.hbm [resolvable:$true] %s118_s23 }
   0xd   :  { %v63_v2 = vadd.f32 1.0, %v61_v0  ;;  %v64_v3 = vadd.f32 1.0, %v62_v1  ;;  %v67_v12 = vld [vmem:[#allocation5] sm:$0xff]  ;;  %v68_v13 = vld [vmem:[#allocation5 + $0x8] sm:$0xff]  ;;  %s116_s1 = sshll.u32 %s225_s0, 4  ;;  %s117_s1 = int_to_ptr.vmem [resolvable:$true] %s116_s1 }
   0xe   :  { %v69_v14 = vadd.f32 1.0, %v67_v12  ;;  %v70_v15 = vadd.f32 1.0, %v68_v13 }
   0xf   :  { %v65_v4 = vmul.f32 0.5, %v63_v2  ;;  %v66_v5 = vmul.f32 0.5, %v64_v3 }
  0x10   :  { %v71_v18 = vmul.f32 0.5, %v69_v14  ;;  %v72_v21 = vmul.f32 0.5, %v70_v15 }
  0x11   :  { %v79_v6 = vand.u32 2147483647, %v65_v4  ;;  %v80_v7 = vand.u32 2147483647, %v66_v5  ;;  %v73_v25 = vmax.f32 %v65_v4, 0.0  ;;  %v74_v29 = vmax.f32 %v66_v5, 0.0 }
  0x12   :  { %v75_v26 = vmul.f32 %v71_v18, %v65_v4  ;;  %v76_v30 = vmul.f32 %v72_v21, %v66_v5 }
  0x13   :  { %v81_v8 = vsub.f32 0.0, %v79_v6  ;;  %v82_v9 = vsub.f32 0.0, %v80_v7 }
  0x14   :  { %v77_v34 = vsub.f32 %v73_v25, %v75_v26  ;;  %v78_v37 = vsub.f32 %v74_v29, %v76_v30 }
  0x15   :  { %v83_v10 = vmul.f32 1.442695, %v81_v8  ;;  %v85_v11 = vmul.f32 1.442695, %v82_v9 }
  0x17   :  { %135 = vpow2.f32 %v83_v10 }
  0x18   :  { %137 = vpow2.f32 %v85_v11 }
  0x1d   :  { %v136_v16 = vpop.eup %135 }
  0x1e   :  { %v138_v17 = vpop.eup %137  ;;  %v87_v19 = vadd.f32 1.0, %v136_v16  ;;  %v90_v20 = vmul.f32 -0.5, %v136_v16  ;;  %v93_v27 = vand.u32 2147483647, %v136_v16 }
  0x1f   :  { %v96_v22 = vadd.f32 1.0, %v138_v17  ;;  %v99_v23 = vmul.f32 -0.5, %v138_v17  ;;  %v102_v31 = vand.u32 2147483647, %v138_v17 }
  0x20   :  { %139 = vlog2.f32 %v87_v19  ;;  %v91_v24 = vadd.f32 1.0, %v90_v20  ;;  %vm94_vm0 = vcmp.lt.f32.partialorder %v93_v27, 0.0004427343 }
  0x21   :  { %141 = vlog2.f32 %v96_v22  ;;  %v100_v28 = vadd.f32 1.0, %v99_v23  ;;  %vm103_vm1 = vcmp.lt.f32.partialorder %v102_v31, 0.0004427343 }
  0x22   :  { %v92_v32 = vmul.f32 %v136_v16, %v91_v24 }
  0x23   :  { %v101_v35 = vmul.f32 %v138_v17, %v100_v28 }
  0x26   :  { %v140_v33 = vpop.eup %139 }
  0x27   :  { %v142_v36 = vpop.eup %141  ;;  %v89_v38 = vmul.f32 0.6931472, %v140_v33 }
  0x28   :  { %v98_v39 = vmul.f32 0.6931472, %v142_v36 }
  0x29   :  { %v95_v40 = vsel %vm94_vm0, %v92_v32, %v89_v38 }
  0x2a   :  { %v104_v41 = vsel %vm103_vm1, %v101_v35, %v98_v39  ;;  %v105_v42 = vadd.f32 %v95_v40, %v77_v34 }
  0x2b   :  { %v106_v43 = vadd.f32 %v104_v41, %v78_v37 }
  0x2d   :  { %v108_v44 = vadd.f32 %v106_v43, %v105_v42 }
  0x2f   :  { %110 = vst [vmem:[#allocation7] sm:$0xff] %v108_v44 }
  0x30   :  { %121 = dma.vmem_to_hbm [thread:$0]  %s117_s1, 128, %s119_s23, [#allocation4]  }
  0x31   :  { %219 = dma.done.wait [#allocation4], 128  }
  0x32   :  { %220 = vsyncadd [#allocation4], 4294967168 }
  0x33   :  { %126 = vsyncpa [#allocation3], 1 }
  0x34   :  { %127 = vsyncpa [#allocation6], 1 }
  0x35   :  { %128 = vsyncpa [#allocation4], 1 }

</bundles_post_ra>
